<compile_context>
chip_gen: v5e
topology: v5e:2x2
jax: 0.10.0
libtpu: 0.0.40
codegen_flags: <defaults>
</compile_context>

<pallas_src>
import jax
import jax.numpy as jnp
from jax import lax
from jax.experimental import pallas as pl
from jax.experimental.pallas import tpu as pltpu


LAMBDA_CLASS = 1.0
LAMBDA_NOOBJ = 10.0
LAMBDA_OBJ = 1.0
LAMBDA_BOX = 10.0


def _bce_with_logits(x, z):
    # numerically stable:  max(x,0) - x*z + log(1 + exp(-|x|))
    return jnp.maximum(x, 0.0) - x * z + jnp.log1p(jnp.exp(-jnp.abs(x)))


def _yolo_loss_kernel(pred_ref, tgt_ref, anc_ref, out_ref):
    """One (D, TILE_R, 128) slab of one anchor.

    pred_ref : (D, TILE_R, 128)  feature-major predictions (D = 5 + C)
    tgt_ref  : (6, TILE_R, 128)  feature-major targets
    anc_ref  : (A, 4)            SMEM table [w, h, 1/w, 1/h] per anchor
    out_ref  : (8, TILE_R=?, ..) -> (8, 128) per-anchor partial-sum block,
               used directly as the resident accumulator across the tile axis.
    """
    a = pl.program_id(0)
    i = pl.program_id(1)

    @pl.when(i == 0)
    def _():
        out_ref[...] = jnp.zeros_like(out_ref)

    # Per-anchor scalars from SMEM (true scalar loads, lane-broadcast for free).
    aw = anc_ref[a, 0]
    ah = anc_ref[a, 1]
    inv_aw = anc_ref[a, 2]
    inv_ah = anc_ref[a, 3]

    # Dense (TILE_R, 128) feature planes.
    x_obj = pred_ref[0].astype(jnp.float32)
    px = pred_ref[1].astype(jnp.float32)
    py = pred_ref[2].astype(jnp.float32)
    w_logit = pred_ref[3].astype(jnp.float32)
    h_logit = pred_ref[4].astype(jnp.float32)
    logits = pred_ref[5:, :, :].astype(jnp.float32)       # (C, TILE_R, 128)

    t_obj = tgt_ref[0].astype(jnp.float32)
    tx = tgt_ref[1].astype(jnp.float32)
    ty = tgt_ref[2].astype(jnp.float32)
    tw = tgt_ref[3].astype(jnp.float32)
    th = tgt_ref[4].astype(jnp.float32)
    cls = tgt_ref[5].astype(jnp.int32)

    obj_m = t_obj == 1.0
    noobj_m = t_obj == 0.0

    # BCE-with-logits base max(x,0)+log1p(exp(-|x|)): computed once, reused for
    # the noobj term (z == 0) and the obj term (subtract x * iou).
    bce_base = jnp.maximum(x_obj, 0.0) + jnp.log1p(jnp.exp(-jnp.abs(x_obj)))

    # ---- decoded box predictions ----
    sx = jax.nn.sigmoid(px)
    sy = jax.nn.sigmoid(py)
    pw = jnp.exp(w_logit) * aw
    ph = jnp.exp(h_logit) * ah

    # ---- IoU (midpoint box format) ----
    b1x1 = sx - pw * 0.5
    b1y1 = sy - ph * 0.5
    b1x2 = sx + pw * 0.5
    b1y2 = sy + ph * 0.5
    b2x1 = tx - tw * 0.5
    b2y1 = ty - th * 0.5
    b2x2 = tx + tw * 0.5
    b2y2 = ty + th * 0.5
    iw = jnp.maximum(jnp.minimum(b1x2, b2x2) - jnp.maximum(b1x1, b2x1), 0.0)
    ih = jnp.maximum(jnp.minimum(b1y2, b2y2) - jnp.maximum(b1y1, b2y1), 0.0)
    inter = iw * ih
    a1 = jnp.abs((b1x2 - b1x1) * (b1y2 - b1y1))
    a2 = jnp.abs((b2x2 - b2x1) * (b2y2 - b2y1))
    iou = inter / (a1 + a2 - inter + 1e-6)   # exact divide (1e-4 tolerance)

    # ---- box MSE vs [tx, ty, log(1e-16 + tw/aw), log(1e-16 + th/ah)] ----
    tw_l = jnp.log(1e-16 + tw * inv_aw)
    th_l = jnp.log(1e-16 + th * inv_ah)
    se = ((sx - tx) ** 2 + (sy - ty) ** 2
          + (w_logit - tw_l) ** 2 + (h_logit - th_l) ** 2)

    # ---- class cross-entropy, reduced over the leading (class) axis ----
    m = jnp.max(logits, axis=0)                                 # (TILE_R, 128)
    lse = m + jnp.log(jnp.sum(jnp.exp(logits - m[None]), axis=0))
    row = lax.broadcasted_iota(jnp.int32, logits.shape, 0)      # (C, TILE_R, 128)
    picked = jnp.sum(jnp.where(row == cls[None], logits, 0.0), axis=0)
    ce = lse - picked                                           # (TILE_R, 128)

    # ---- masked partial sums: row-reduce to (1,128), single dense (8,128) RMW
    def rsum(v):
        return jnp.sum(v, axis=0, keepdims=True)                # (1, 128)

    partial = jnp.concatenate([
        rsum(jnp.where(noobj_m, bce_base, 0.0)),                # noobj_sum
        rsum(noobj_m.astype(jnp.float32)),                      # noobj_cnt
        rsum(jnp.where(obj_m, bce_base - x_obj * iou, 0.0)),    # obj_sum
        rsum(obj_m.astype(jnp.float32)),                        # obj_cnt
        rsum(jnp.where(obj_m, se, 0.0)),                        # box_sum
        rsum(jnp.where(obj_m, ce, 0.0)),                        # class_sum
        jnp.zeros((2, 128), jnp.float32),                       # unused rows
    ], axis=0)                                                  # (8, 128)

    out_ref[...] += partial


def _choose_tiling(M, D):
    """Pick (TILE_R, n_tiles, Rp, Mp) for the (R, 128) element layout."""
    R0 = -(-M // 128)                                 # rows of 128 elements
    # VMEM budget: double-buffered f32 inputs (pred + tgt) per sublane-row,
    # kept under ~12 MiB (headroom below the 16 MiB v5e scoped default).
    budget = 12 * 1024 * 1024
    per_row = 2 * (D + 6) * 128 * 4
    cap = max(8, (budget // per_row) // 8 * 8)
    tile_max = min(512, cap)
    n_tiles = -(-R0 // tile_max)
    tile_r = -(-(-(-R0 // n_tiles)) // 8) * 8         # balanced, multiple of 8
    tile_r = max(8, tile_r)
    rp = n_tiles * tile_r
    return tile_r, n_tiles, rp, rp * 128


@jax.jit
def yolo_loss(predictions, target, anchors):
    B, A, S, S2, D = predictions.shape
    assert S == S2 and target.shape[-1] == 6 and anchors.shape == (A, 2)
    M = B * S * S                                     # elements per anchor

    # Feature-major, anchor-major layout: (A, features, elements).
    pred3 = jnp.transpose(predictions, (1, 4, 0, 2, 3)).reshape(A, D, M)
    tgt3 = jnp.transpose(target, (1, 4, 0, 2, 3)).reshape(A, 6, M)

    TILE_R, n_tiles, Rp, Mp = _choose_tiling(M, D)
    pad = Mp - M
    if pad:
        pred3 = jnp.pad(pred3, ((0, 0), (0, 0), (0, pad)))
        tdt = tgt3.dtype
        pad_t = jnp.concatenate([
            jnp.full((A, 1, pad), -1.0, tdt),         # obj flag: neither mask
            jnp.zeros((A, 5, pad), tdt),              # benign box / class values
        ], axis=1)
        tgt3 = jnp.concatenate([tgt3, pad_t], axis=2)

    # (A, D, Rp, 128): elements dense over sublanes AND lanes.
    pred4 = pred3.reshape(A, D, Rp, 128)
    tgt4 = tgt3.reshape(A, 6, Rp, 128)

    # Tiny per-anchor SMEM table [w, h, 1/w, 1/h].
    anc = anchors.astype(jnp.float32).reshape(A, 2)
    anc4 = jnp.concatenate([anc, 1.0 / anc], axis=1)  # (A, 4)

    sums = pl.pallas_call(
        _yolo_loss_kernel,
        out_shape=jax.ShapeDtypeStruct((A, 8, 128), jnp.float32),
        grid_spec=pltpu.PrefetchScalarGridSpec(
            num_scalar_prefetch=0,
            grid=(A, n_tiles),
            in_specs=[
                pl.BlockSpec((None, D, TILE_R, 128),
                             lambda a, i: (a, 0, i, 0)),
                pl.BlockSpec((None, 6, TILE_R, 128),
                             lambda a, i: (a, 0, i, 0)),
                pl.BlockSpec(memory_space=pltpu.MemorySpace.SMEM),
            ],
            out_specs=pl.BlockSpec((None, 8, 128), lambda a, i: (a, 0, 0)),
        ),
        compiler_params=pltpu.CompilerParams(
            dimension_semantics=("parallel", "arbitrary")),
    )(pred4, tgt4, anc4)

    s = jnp.sum(sums, axis=(0, 2))                    # (8,): combine anchors + lanes
    noobj_sum, noobj_cnt = s[0], s[1]
    obj_sum, obj_cnt = s[2], s[3]
    box_sum, class_sum = s[4], s[5]

    no_object_loss = noobj_sum / noobj_cnt
    object_loss = obj_sum / obj_cnt
    box_loss = box_sum / (obj_cnt * 4.0)              # MSE mean over 4 coords per obj row
    class_loss = class_sum / obj_cnt                  # CE mean over obj rows

    return (LAMBDA_BOX * box_loss + LAMBDA_OBJ * object_loss
            + LAMBDA_NOOBJ * no_object_loss + LAMBDA_CLASS * class_loss)


def yolo_loss_ref(pred, target, anchors):
    """Pure-JAX reference mirroring the PyTorch forward semantics."""
    pred = pred.astype(jnp.float32)
    target = target.astype(jnp.float32)
    A = pred.shape[1]
    obj = target[..., 0] == 1.0
    noobj = target[..., 0] == 0.0

    x = pred[..., 0]
    bce = _bce_with_logits
    no_object_loss = (jnp.sum(jnp.where(noobj, bce(x, target[..., 0]), 0.0))
                      / jnp.sum(noobj))

    anc = anchors.reshape(1, A, 1, 1, 2)
    sx = jax.nn.sigmoid(pred[..., 1])
    sy = jax.nn.sigmoid(pred[..., 2])
    pw = jnp.exp(pred[..., 3]) * anc[..., 0]
    ph = jnp.exp(pred[..., 4]) * anc[..., 1]
    tx, ty, tw, th = (target[..., 1], target[..., 2],
                      target[..., 3], target[..., 4])

    b1x1, b1y1, b1x2, b1y2 = sx - pw / 2, sy - ph / 2, sx + pw / 2, sy + ph / 2
    b2x1, b2y1, b2x2, b2y2 = tx - tw / 2, ty - th / 2, tx + tw / 2, ty + th / 2
    inter = (jnp.maximum(jnp.minimum(b1x2, b2x2) - jnp.maximum(b1x1, b2x1), 0.0)
             * jnp.maximum(jnp.minimum(b1y2, b2y2) - jnp.maximum(b1y1, b2y1), 0.0))
    a1 = jnp.abs((b1x2 - b1x1) * (b1y2 - b1y1))
    a2 = jnp.abs((b2x2 - b2x1) * (b2y2 - b2y1))
    iou = inter / (a1 + a2 - inter + 1e-6)

    object_loss = (jnp.sum(jnp.where(obj, bce(x, iou * target[..., 0]), 0.0))
                   / jnp.sum(obj))

    tw_l = jnp.log(1e-16 + tw / anc[..., 0])
    th_l = jnp.log(1e-16 + th / anc[..., 1])
    se = ((sx - tx) ** 2 + (sy - ty) ** 2
          + (pred[..., 3] - tw_l) ** 2 + (pred[..., 4] - th_l) ** 2)
    box_loss = jnp.sum(jnp.where(obj, se, 0.0)) / (jnp.sum(obj) * 4)

    logprob = jax.nn.log_softmax(pred[..., 5:], axis=-1)
    cls = jnp.clip(target[..., 5].astype(jnp.int32), 0, None)
    picked = jnp.take_along_axis(logprob, cls[..., None], axis=-1)[..., 0]
    class_loss = jnp.sum(jnp.where(obj, -picked, 0.0)) / jnp.sum(obj)

    return (LAMBDA_BOX * box_loss + LAMBDA_OBJ * object_loss
            + LAMBDA_NOOBJ * no_object_loss + LAMBDA_CLASS * class_loss)


if __name__ == "__main__":
    B, A, S, C = 2, 3, 8, 4  # small shapes; D = 5 + C = 9
    key = jax.random.PRNGKey(0)
    k1, k2, k3, k4, k5 = jax.random.split(key, 5)

    predictions = jax.random.normal(k1, (B, A, S, S, 5 + C), jnp.float32)

    obj_flag = jax.random.choice(
        k2, jnp.array([1.0, 0.0, -1.0], jnp.float32), (B, A, S, S),
        p=jnp.array([0.2, 0.7, 0.1], jnp.float32))
    xy = jax.random.uniform(k3, (B, A, S, S, 2), minval=0.05, maxval=0.95)
    wh = jax.random.uniform(k4, (B, A, S, S, 2), minval=0.1, maxval=2.0)
    cls = jax.random.randint(k5, (B, A, S, S), 0, C).astype(jnp.float32)
    target = jnp.concatenate(
        [obj_flag[..., None], xy, wh, cls[..., None]], axis=-1)

    # Deterministic synthetic anchors (normalized w, h per anchor).
    anchors = jnp.array([[0.28, 0.22], [0.38, 0.48], [0.90, 0.78]], jnp.float32)

    loss = yolo_loss(predictions, target, anchors)
    loss = jax.block_until_ready(loss)

    ref = yolo_loss_ref(predictions, target, anchors)
    assert jnp.isfinite(loss), "kernel produced non-finite loss"
    assert jnp.allclose(loss, ref, rtol=1e-4, atol=1e-4), (loss, ref)

    print("KERNEL_OK")
</pallas_src>

<mosaic_0001>
module attributes {stable_mosaic.version = 11 : i64} {
  func.func @_yolo_loss_kernel(%arg0: i32, %arg1: i32, %arg2: memref<1x9x8x128xf32, #tpu.memory_space<vmem>>, %arg3: memref<1x6x8x128xf32, #tpu.memory_space<vmem>>, %arg4: memref<3x4xf32, #tpu.memory_space<smem>>, %arg5: memref<1x8x128xf32, #tpu.memory_space<vmem>>) attributes {dimension_semantics = [#tpu.dimension_semantics<parallel>, #tpu.dimension_semantics<arbitrary>], iteration_bounds = array<i64: 3, 1>, scalar_prefetch = 0 : i64, scratch_operands = 0 : i64, tpu.core_type = #tpu.core_type<tc>, window_params = [{transform_indices = @transform_0, window_bounds = array<i64: 1, 9, 8, 128>}, {transform_indices = @transform_1, window_bounds = array<i64: 1, 6, 8, 128>}, {transform_indices = @transform_2, window_bounds = array<i64: 3, 4>}, {transform_indices = @transform_3, window_bounds = array<i64: 1, 8, 128>}]} {
    %c0_i32 = arith.constant 0 : i32
    %0 = arith.cmpi eq, %arg1, %c0_i32 : i32
    %1 = arith.extui %0 : i1 to i32
    %c0_i32_0 = arith.constant 0 : i32
    %2 = arith.cmpi ne, %1, %c0_i32_0 : i32
    scf.if %2 {
      %cst_86 = arith.constant 0.000000e+00 : f32
      %183 = vector.broadcast %cst_86 : f32 to vector<8x128xf32>
      %c0_87 = arith.constant 0 : index
      %c0_88 = arith.constant 0 : index
      %c0_89 = arith.constant 0 : index
      %184 = vector.load %arg5[%c0_87, %c0_88, %c0_89] : memref<1x8x128xf32, #tpu.memory_space<vmem>>, vector<1x8x128xf32>
      %185 = vector.shape_cast %184 : vector<1x8x128xf32> to vector<8x128xf32>
      %186 = vector.shape_cast %183 : vector<8x128xf32> to vector<1x8x128xf32>
      tpu.vector_store %arg5[%c0_87, %c0_88, %c0_89], %186 {strides = array<i32>} : memref<1x8x128xf32, #tpu.memory_space<vmem>>, vector<1x8x128xf32>,
    } else {
    }
    %3 = arith.index_cast %arg0 : i32 to index
    %c0 = arith.constant 0 : index
    %4 = memref.load %arg4[%3, %c0] : memref<3x4xf32, #tpu.memory_space<smem>>
    %5 = arith.index_cast %arg0 : i32 to index
    %c1 = arith.constant 1 : index
    %6 = memref.load %arg4[%5, %c1] : memref<3x4xf32, #tpu.memory_space<smem>>
    %7 = arith.index_cast %arg0 : i32 to index
    %c2 = arith.constant 2 : index
    %8 = memref.load %arg4[%7, %c2] : memref<3x4xf32, #tpu.memory_space<smem>>
    %9 = arith.index_cast %arg0 : i32 to index
    %c3 = arith.constant 3 : index
    %10 = memref.load %arg4[%9, %c3] : memref<3x4xf32, #tpu.memory_space<smem>>
    %c0_1 = arith.constant 0 : index
    %c0_2 = arith.constant 0 : index
    %c0_3 = arith.constant 0 : index
    %c0_4 = arith.constant 0 : index
    %11 = vector.load %arg2[%c0_1, %c0_2, %c0_3, %c0_4] : memref<1x9x8x128xf32, #tpu.memory_space<vmem>>, vector<1x1x8x128xf32>
    %12 = vector.shape_cast %11 : vector<1x1x8x128xf32> to vector<8x128xf32>
    %c0_5 = arith.constant 0 : index
    %c1_6 = arith.constant 1 : index
    %c0_7 = arith.constant 0 : index
    %c0_8 = arith.constant 0 : index
    %13 = vector.load %arg2[%c0_5, %c1_6, %c0_7, %c0_8] : memref<1x9x8x128xf32, #tpu.memory_space<vmem>>, vector<1x1x8x128xf32>
    %14 = vector.shape_cast %13 : vector<1x1x8x128xf32> to vector<8x128xf32>
    %c0_9 = arith.constant 0 : index
    %c2_10 = arith.constant 2 : index
    %c0_11 = arith.constant 0 : index
    %c0_12 = arith.constant 0 : index
    %15 = vector.load %arg2[%c0_9, %c2_10, %c0_11, %c0_12] : memref<1x9x8x128xf32, #tpu.memory_space<vmem>>, vector<1x1x8x128xf32>
    %16 = vector.shape_cast %15 : vector<1x1x8x128xf32> to vector<8x128xf32>
    %c0_13 = arith.constant 0 : index
    %c3_14 = arith.constant 3 : index
    %c0_15 = arith.constant 0 : index
    %c0_16 = arith.constant 0 : index
    %17 = vector.load %arg2[%c0_13, %c3_14, %c0_15, %c0_16] : memref<1x9x8x128xf32, #tpu.memory_space<vmem>>, vector<1x1x8x128xf32>
    %18 = vector.shape_cast %17 : vector<1x1x8x128xf32> to vector<8x128xf32>
    %c0_17 = arith.constant 0 : index
    %c4 = arith.constant 4 : index
    %c0_18 = arith.constant 0 : index
    %c0_19 = arith.constant 0 : index
    %19 = vector.load %arg2[%c0_17, %c4, %c0_18, %c0_19] : memref<1x9x8x128xf32, #tpu.memory_space<vmem>>, vector<1x1x8x128xf32>
    %20 = vector.shape_cast %19 : vector<1x1x8x128xf32> to vector<8x128xf32>
    %c0_20 = arith.constant 0 : index
    %c5 = arith.constant 5 : index
    %c0_21 = arith.constant 0 : index
    %c0_22 = arith.constant 0 : index
    %21 = vector.load %arg2[%c0_20, %c5, %c0_21, %c0_22] : memref<1x9x8x128xf32, #tpu.memory_space<vmem>>, vector<1x4x8x128xf32>
    %22 = vector.shape_cast %21 : vector<1x4x8x128xf32> to vector<4x8x128xf32>
    %c0_23 = arith.constant 0 : index
    %c0_24 = arith.constant 0 : index
    %c0_25 = arith.constant 0 : index
    %c0_26 = arith.constant 0 : index
    %23 = vector.load %arg3[%c0_23, %c0_24, %c0_25, %c0_26] : memref<1x6x8x128xf32, #tpu.memory_space<vmem>>, vector<1x1x8x128xf32>
    %24 = vector.shape_cast %23 : vector<1x1x8x128xf32> to vector<8x128xf32>
    %c0_27 = arith.constant 0 : index
    %c1_28 = arith.constant 1 : index
    %c0_29 = arith.constant 0 : index
    %c0_30 = arith.constant 0 : index
    %25 = vector.load %arg3[%c0_27, %c1_28, %c0_29, %c0_30] : memref<1x6x8x128xf32, #tpu.memory_space<vmem>>, vector<1x1x8x128xf32>
    %26 = vector.shape_cast %25 : vector<1x1x8x128xf32> to vector<8x128xf32>
    %c0_31 = arith.constant 0 : index
    %c2_32 = arith.constant 2 : index
    %c0_33 = arith.constant 0 : index
    %c0_34 = arith.constant 0 : index
    %27 = vector.load %arg3[%c0_31, %c2_32, %c0_33, %c0_34] : memref<1x6x8x128xf32, #tpu.memory_space<vmem>>, vector<1x1x8x128xf32>
    %28 = vector.shape_cast %27 : vector<1x1x8x128xf32> to vector<8x128xf32>
    %c0_35 = arith.constant 0 : index
    %c3_36 = arith.constant 3 : index
    %c0_37 = arith.constant 0 : index
    %c0_38 = arith.constant 0 : index
    %29 = vector.load %arg3[%c0_35, %c3_36, %c0_37, %c0_38] : memref<1x6x8x128xf32, #tpu.memory_space<vmem>>, vector<1x1x8x128xf32>
    %30 = vector.shape_cast %29 : vector<1x1x8x128xf32> to vector<8x128xf32>
    %c0_39 = arith.constant 0 : index
    %c4_40 = arith.constant 4 : index
    %c0_41 = arith.constant 0 : index
    %c0_42 = arith.constant 0 : index
    %31 = vector.load %arg3[%c0_39, %c4_40, %c0_41, %c0_42] : memref<1x6x8x128xf32, #tpu.memory_space<vmem>>, vector<1x1x8x128xf32>
    %32 = vector.shape_cast %31 : vector<1x1x8x128xf32> to vector<8x128xf32>
    %c0_43 = arith.constant 0 : index
    %c5_44 = arith.constant 5 : index
    %c0_45 = arith.constant 0 : index
    %c0_46 = arith.constant 0 : index
    %33 = vector.load %arg3[%c0_43, %c5_44, %c0_45, %c0_46] : memref<1x6x8x128xf32, #tpu.memory_space<vmem>>, vector<1x1x8x128xf32>
    %34 = vector.shape_cast %33 : vector<1x1x8x128xf32> to vector<8x128xf32>
    %35 = arith.fptosi %34 : vector<8x128xf32> to vector<8x128xi32>
    %cst = arith.constant 1.000000e+00 : f32
    %36 = vector.broadcast %cst : f32 to vector<8x128xf32>
    %37 = arith.cmpf oeq, %24, %36 : vector<8x128xf32>
    %cst_47 = arith.constant 0.000000e+00 : f32
    %38 = vector.broadcast %cst_47 : f32 to vector<8x128xf32>
    %39 = arith.cmpf oeq, %24, %38 : vector<8x128xf32>
    %cst_48 = arith.constant 0.000000e+00 : f32
    %40 = vector.broadcast %cst_48 : f32 to vector<8x128xf32>
    %41 = arith.maximumf %12, %40 : vector<8x128xf32>
    %42 = math.absf %12 : vector<8x128xf32>
    %cst_49 = arith.constant 0.000000e+00 : f32
    %43 = vector.broadcast %cst_49 : f32 to vector<8x128xf32>
    %44 = arith.subf %43, %42 : vector<8x128xf32>
    %45 = math.exp %44 : vector<8x128xf32>
    %46 = math.log1p %45 : vector<8x128xf32>
    %47 = arith.addf %41, %46 : vector<8x128xf32>
    %48 = arith.negf %14 : vector<8x128xf32>
    %49 = math.exp %48 : vector<8x128xf32>
    %cst_50 = arith.constant 1.000000e+00 : f32
    %50 = vector.broadcast %cst_50 : f32 to vector<8x128xf32>
    %51 = arith.addf %50, %49 : vector<8x128xf32>
    %52 = arith.divf %50, %51 : vector<8x128xf32>
    %53 = arith.negf %16 : vector<8x128xf32>
    %54 = math.exp %53 : vector<8x128xf32>
    %cst_51 = arith.constant 1.000000e+00 : f32
    %55 = vector.broadcast %cst_51 : f32 to vector<8x128xf32>
    %56 = arith.addf %55, %54 : vector<8x128xf32>
    %57 = arith.divf %55, %56 : vector<8x128xf32>
    %58 = math.exp %18 : vector<8x128xf32>
    %59 = vector.broadcast %4 : f32 to vector<8x128xf32>
    %60 = arith.mulf %58, %59 : vector<8x128xf32>
    %61 = math.exp %20 : vector<8x128xf32>
    %62 = vector.broadcast %6 : f32 to vector<8x128xf32>
    %63 = arith.mulf %61, %62 : vector<8x128xf32>
    %cst_52 = arith.constant 5.000000e-01 : f32
    %64 = vector.broadcast %cst_52 : f32 to vector<8x128xf32>
    %65 = arith.mulf %60, %64 : vector<8x128xf32>
    %66 = arith.subf %52, %65 : vector<8x128xf32>
    %cst_53 = arith.constant 5.000000e-01 : f32
    %67 = vector.broadcast %cst_53 : f32 to vector<8x128xf32>
    %68 = arith.mulf %63, %67 : vector<8x128xf32>
    %69 = arith.subf %57, %68 : vector<8x128xf32>
    %cst_54 = arith.constant 5.000000e-01 : f32
    %70 = vector.broadcast %cst_54 : f32 to vector<8x128xf32>
    %71 = arith.mulf %60, %70 : vector<8x128xf32>
    %72 = arith.addf %52, %71 : vector<8x128xf32>
    %cst_55 = arith.constant 5.000000e-01 : f32
    %73 = vector.broadcast %cst_55 : f32 to vector<8x128xf32>
    %74 = arith.mulf %63, %73 : vector<8x128xf32>
    %75 = arith.addf %57, %74 : vector<8x128xf32>
    %cst_56 = arith.constant 5.000000e-01 : f32
    %76 = vector.broadcast %cst_56 : f32 to vector<8x128xf32>
    %77 = arith.mulf %30, %76 : vector<8x128xf32>
    %78 = arith.subf %26, %77 : vector<8x128xf32>
    %cst_57 = arith.constant 5.000000e-01 : f32
    %79 = vector.broadcast %cst_57 : f32 to vector<8x128xf32>
    %80 = arith.mulf %32, %79 : vector<8x128xf32>
    %81 = arith.subf %28, %80 : vector<8x128xf32>
    %cst_58 = arith.constant 5.000000e-01 : f32
    %82 = vector.broadcast %cst_58 : f32 to vector<8x128xf32>
    %83 = arith.mulf %30, %82 : vector<8x128xf32>
    %84 = arith.addf %26, %83 : vector<8x128xf32>
    %cst_59 = arith.constant 5.000000e-01 : f32
    %85 = vector.broadcast %cst_59 : f32 to vector<8x128xf32>
    %86 = arith.mulf %32, %85 : vector<8x128xf32>
    %87 = arith.addf %28, %86 : vector<8x128xf32>
    %88 = arith.minimumf %72, %84 : vector<8x128xf32>
    %89 = arith.maximumf %66, %78 : vector<8x128xf32>
    %90 = arith.subf %88, %89 : vector<8x128xf32>
    %cst_60 = arith.constant 0.000000e+00 : f32
    %91 = vector.broadcast %cst_60 : f32 to vector<8x128xf32>
    %92 = arith.maximumf %90, %91 : vector<8x128xf32>
    %93 = arith.minimumf %75, %87 : vector<8x128xf32>
    %94 = arith.maximumf %69, %81 : vector<8x128xf32>
    %95 = arith.subf %93, %94 : vector<8x128xf32>
    %cst_61 = arith.constant 0.000000e+00 : f32
    %96 = vector.broadcast %cst_61 : f32 to vector<8x128xf32>
    %97 = arith.maximumf %95, %96 : vector<8x128xf32>
    %98 = arith.mulf %92, %97 : vector<8x128xf32>
    %99 = arith.subf %72, %66 : vector<8x128xf32>
    %100 = arith.subf %75, %69 : vector<8x128xf32>
    %101 = arith.mulf %99, %100 : vector<8x128xf32>
    %102 = math.absf %101 : vector<8x128xf32>
    %103 = arith.subf %84, %78 : vector<8x128xf32>
    %104 = arith.subf %87, %81 : vector<8x128xf32>
    %105 = arith.mulf %103, %104 : vector<8x128xf32>
    %106 = math.absf %105 : vector<8x128xf32>
    %107 = arith.addf %102, %106 : vector<8x128xf32>
    %108 = arith.subf %107, %98 : vector<8x128xf32>
    %cst_62 = arith.constant 9.99999997E-7 : f32
    %109 = vector.broadcast %cst_62 : f32 to vector<8x128xf32>
    %110 = arith.addf %108, %109 : vector<8x128xf32>
    %111 = arith.divf %98, %110 : vector<8x128xf32>
    %112 = vector.broadcast %8 : f32 to vector<8x128xf32>
    %113 = arith.mulf %30, %112 : vector<8x128xf32>
    %cst_63 = arith.constant 1.000000e-16 : f32
    %114 = vector.broadcast %cst_63 : f32 to vector<8x128xf32>
    %115 = arith.addf %114, %113 : vector<8x128xf32>
    %116 = math.log %115 : vector<8x128xf32>
    %117 = vector.broadcast %10 : f32 to vector<8x128xf32>
    %118 = arith.mulf %32, %117 : vector<8x128xf32>
    %cst_64 = arith.constant 1.000000e-16 : f32
    %119 = vector.broadcast %cst_64 : f32 to vector<8x128xf32>
    %120 = arith.addf %119, %118 : vector<8x128xf32>
    %121 = math.log %120 : vector<8x128xf32>
    %122 = arith.subf %52, %26 : vector<8x128xf32>
    %123 = arith.mulf %122, %122 : vector<8x128xf32>
    %124 = arith.subf %57, %28 : vector<8x128xf32>
    %125 = arith.mulf %124, %124 : vector<8x128xf32>
    %126 = arith.addf %123, %125 : vector<8x128xf32>
    %127 = arith.subf %18, %116 : vector<8x128xf32>
    %128 = arith.mulf %127, %127 : vector<8x128xf32>
    %129 = arith.addf %126, %128 : vector<8x128xf32>
    %130 = arith.subf %20, %121 : vector<8x128xf32>
    %131 = arith.mulf %130, %130 : vector<8x128xf32>
    %132 = arith.addf %129, %131 : vector<8x128xf32>
    %cst_65 = arith.constant dense<0xFF800000> : vector<8x128xf32>
    %133 = vector.multi_reduction <maximumf>, %22, %cst_65 [0] : vector<4x8x128xf32> to vector<8x128xf32>
    %134 = vector.shape_cast %133 : vector<8x128xf32> to vector<1x8x128xf32>
    %135 = vector.broadcast %134 : vector<1x8x128xf32> to vector<4x8x128xf32>
    %136 = arith.subf %22, %135 : vector<4x8x128xf32>
    %137 = math.exp %136 : vector<4x8x128xf32>
    %cst_66 = arith.constant dense<0.000000e+00> : vector<8x128xf32>
    %138 = vector.multi_reduction <add>, %137, %cst_66 [0] : vector<4x8x128xf32> to vector<8x128xf32>
    %139 = math.log %138 : vector<8x128xf32>
    %140 = arith.addf %133, %139 : vector<8x128xf32>
    %141 = tpu.iota {dimensions = array<i32: 0>} : vector<4x8x128xi32>
    %142 = vector.shape_cast %35 : vector<8x128xi32> to vector<1x8x128xi32>
    %143 = vector.broadcast %142 : vector<1x8x128xi32> to vector<4x8x128xi32>
    %144 = arith.cmpi eq, %141, %143 : vector<4x8x128xi32>
    %cst_67 = arith.constant 0.000000e+00 : f32
    %145 = vector.broadcast %cst_67 : f32 to vector<4x8x128xf32>
    %146 = arith.select %144, %22, %145 : vector<4x8x128xi1>, vector<4x8x128xf32>
    %cst_68 = arith.constant dense<0.000000e+00> : vector<8x128xf32>
    %147 = vector.multi_reduction <add>, %146, %cst_68 [0] : vector<4x8x128xf32> to vector<8x128xf32>
    %148 = arith.subf %140, %147 : vector<8x128xf32>
    %cst_69 = arith.constant 0.000000e+00 : f32
    %149 = vector.broadcast %cst_69 : f32 to vector<8x128xf32>
    %150 = arith.select %39, %47, %149 : vector<8x128xi1>, vector<8x128xf32>
    %cst_70 = arith.constant dense<0.000000e+00> : vector<128xf32>
    %151 = vector.multi_reduction <add>, %150, %cst_70 [0] : vector<8x128xf32> to vector<128xf32>
    %152 = vector.shape_cast %151 : vector<128xf32> to vector<1x128xf32>
    %153 = arith.extui %39 : vector<8x128xi1> to vector<8x128xi32>
    %154 = arith.sitofp %153 : vector<8x128xi32> to vector<8x128xf32>
    %cst_71 = arith.constant dense<0.000000e+00> : vector<128xf32>
    %155 = vector.multi_reduction <add>, %154, %cst_71 [0] : vector<8x128xf32> to vector<128xf32>
    %156 = vector.shape_cast %155 : vector<128xf32> to vector<1x128xf32>
    %157 = arith.mulf %12, %111 : vector<8x128xf32>
    %158 = arith.subf %47, %157 : vector<8x128xf32>
    %cst_72 = arith.constant 0.000000e+00 : f32
    %159 = vector.broadcast %cst_72 : f32 to vector<8x128xf32>
    %160 = arith.select %37, %158, %159 : vector<8x128xi1>, vector<8x128xf32>
    %cst_73 = arith.constant dense<0.000000e+00> : vector<128xf32>
    %161 = vector.multi_reduction <add>, %160, %cst_73 [0] : vector<8x128xf32> to vector<128xf32>
    %162 = vector.shape_cast %161 : vector<128xf32> to vector<1x128xf32>
    %163 = arith.extui %37 : vector<8x128xi1> to vector<8x128xi32>
    %164 = arith.sitofp %163 : vector<8x128xi32> to vector<8x128xf32>
    %cst_74 = arith.constant dense<0.000000e+00> : vector<128xf32>
    %165 = vector.multi_reduction <add>, %164, %cst_74 [0] : vector<8x128xf32> to vector<128xf32>
    %166 = vector.shape_cast %165 : vector<128xf32> to vector<1x128xf32>
    %cst_75 = arith.constant 0.000000e+00 : f32
    %167 = vector.broadcast %cst_75 : f32 to vector<8x128xf32>
    %168 = arith.select %37, %132, %167 : vector<8x128xi1>, vector<8x128xf32>
    %cst_76 = arith.constant dense<0.000000e+00> : vector<128xf32>
    %169 = vector.multi_reduction <add>, %168, %cst_76 [0] : vector<8x128xf32> to vector<128xf32>
    %170 = vector.shape_cast %169 : vector<128xf32> to vector<1x128xf32>
    %cst_77 = arith.constant 0.000000e+00 : f32
    %171 = vector.broadcast %cst_77 : f32 to vector<8x128xf32>
    %172 = arith.select %37, %148, %171 : vector<8x128xi1>, vector<8x128xf32>
    %cst_78 = arith.constant dense<0.000000e+00> : vector<128xf32>
    %173 = vector.multi_reduction <add>, %172, %cst_78 [0] : vector<8x128xf32> to vector<128xf32>
    %174 = vector.shape_cast %173 : vector<128xf32> to vector<1x128xf32>
    %cst_79 = arith.constant 0.000000e+00 : f32
    %175 = vector.broadcast %cst_79 : f32 to vector<2x128xf32>
    %176 = tpu.concatenate %152, %156, %162, %166, %170, %174, %175 in 0 : vector<1x128xf32>, vector<1x128xf32>, vector<1x128xf32>, vector<1x128xf32>, vector<1x128xf32>, vector<1x128xf32>, vector<2x128xf32> -> vector<8x128xf32>
    %c0_80 = arith.constant 0 : index
    %c0_81 = arith.constant 0 : index
    %c0_82 = arith.constant 0 : index
    %177 = vector.load %arg5[%c0_80, %c0_81, %c0_82] : memref<1x8x128xf32, #tpu.memory_space<vmem>>, vector<1x8x128xf32>
    %178 = vector.shape_cast %177 : vector<1x8x128xf32> to vector<8x128xf32>
    %179 = arith.addf %178, %176 : vector<8x128xf32>
    %c0_83 = arith.constant 0 : index
    %c0_84 = arith.constant 0 : index
    %c0_85 = arith.constant 0 : index
    %180 = vector.load %arg5[%c0_83, %c0_84, %c0_85] : memref<1x8x128xf32, #tpu.memory_space<vmem>>, vector<1x8x128xf32>
    %181 = vector.shape_cast %180 : vector<1x8x128xf32> to vector<8x128xf32>
    %182 = vector.shape_cast %179 : vector<8x128xf32> to vector<1x8x128xf32>
    tpu.vector_store %arg5[%c0_83, %c0_84, %c0_85], %182 {strides = array<i32>} : memref<1x8x128xf32, #tpu.memory_space<vmem>>, vector<1x8x128xf32>,
    return
  }
  func.func @transform_0(%arg0: i32, %arg1: i32) -> (i32, i32, i32, i32) {
    %c0_i32 = arith.constant 0 : i32
    %c0_i32_0 = arith.constant 0 : i32
    %c0_i32_1 = arith.constant 0 : i32
    return %arg0, %c0_i32, %arg1, %c0_i32_0 : i32, i32, i32, i32
  }
  func.func @transform_1(%arg0: i32, %arg1: i32) -> (i32, i32, i32, i32) {
    %c0_i32 = arith.constant 0 : i32
    %c0_i32_0 = arith.constant 0 : i32
    %c0_i32_1 = arith.constant 0 : i32
    return %arg0, %c0_i32, %arg1, %c0_i32_0 : i32, i32, i32, i32
  }
  func.func @transform_2(%arg0: i32, %arg1: i32) -> (i32, i32) {
    %c0_i32 = arith.constant 0 : i32
    %c0_i32_0 = arith.constant 0 : i32
    %c0_i32_1 = arith.constant 0 : i32
    return %c0_i32, %c0_i32_0 : i32, i32
  }
  func.func @transform_3(%arg0: i32, %arg1: i32) -> (i32, i32, i32) {
    %c0_i32 = arith.constant 0 : i32
    %c0_i32_0 = arith.constant 0 : i32
    %c0_i32_1 = arith.constant 0 : i32
    return %arg0, %c0_i32, %c0_i32_0 : i32, i32, i32
  }
}

</mosaic_0001>

<bundles_post_ra>
// kernel: yolo_loss.1
= control target key start
LH: loop header
LB: loop body
LE: loop exit
PB: predicated region body
PF: predicated region fallthrough
CT: control target
= control target key end

     0   :  { %8 = vsyncpa [#allocation3], 0  ;;  %s769_s12 = smov 0   ;;  %s771_s13 = smov 0   ;;  %s961_s0 = inlined_call_operand.vmem [shape: f32[3,9,8,128], index: 0, kind: input, shape index: {}]   ;;  %s962_s1 = inlined_call_operand.vmem [shape: f32[3,6,8,128], index: 1, kind: input, shape index: {}]   ;;  %s963_s2 = inlined_call_operand.vmem [shape: f32[3,4], index: 2, kind: input, shape index: {}]   ;;  %s964_s3 = inlined_call_operand.vmem [shape: f32[3,8,128], index: 3, kind: output, shape index: {}]  }
   0x1   :  { %s773_s14 = smov 0  }
   0x2 LB: > { %s599_s15 = sadd.s32 4294967295, %s745_s14   ;;  %s26_s16 = sadd.s32 1, %s741_s13  ;;  %s745_s14 = sphi %s773_s14, %s14_s14   ;;  %s741_s13 = sphi %s771_s13, %s976_s13   ;;  %s737_s12 = sphi %s769_s12, %s975_s12  }
   0x3   : > { %p28_p0 = scmp.ge.s32.totalorder %s26_s16, 3  ;;  %p601_p1 = scmp.ge.s32.totalorder %s745_s14, 1 }
   0x4   : > { %p134_p2 = scmp.lt.s32.totalorder %s745_s14, 4  ;;  %p644_p4 = scmp.eq.s32.totalorder %s599_s15, 0 }
   0x5   : > { %s978_s16 = smov (%p28_p0, %s26_s16), 0  ;;  %s146_s19 = sshll.u32 %s963_s2, 4  ;;  %s147_s19 = int_to_ptr.vmem [resolvable:$true] %s146_s19 }
   0x6   : > { %p135_p3 = pnand %p601_p1, %p134_p2  ;;  %s747_s20 = smov [#allocation2]  }
   0x8   : > { %p640_p5 = pneg %p135_p3  ;;  %181 = sbr.rel (%p135_p3) target bundleno = 111 (0x6f), region = 32 }
   0xa   : > { %p641_p6 = pnand %p644_p4, %p640_p5 }
   0xc   : > { %643 = dma.vmem_to_smem (!%p641_p6), %s147_s19, 64, %s747_s20, [#allocation3]  }
   0xd   : > { %732 = dma.done.wait (%p644_p4), [#allocation3], 64  }
   0xe   : > { %734 = vsyncadd (%p644_p4), [#allocation3], 4294967232 }
   0xf   : > { %188 = sfence }
  0x10   : > { %p217_p7 = scmp.lt.s32.totalorder %s737_s12, 2  ;;  %s797_s26 = sshll.u32 %s737_s12, 7 }
  0x11   : > { %s244_s28 = sadd.s32 1, %s797_s26  ;;  %s809_s29 = sld [smem:[#allocation2 + %s797_s26]] }
  0x12   : > { %s791_s21 = scalar_select %p217_p7, %s737_s12, 2 }
  0x13   : > { %s817_s30 = sld [smem:[#allocation2 + %s244_s28]]  ;;  %s246_s7 = sadd.s32 2, %s797_s26 }
  0x14   : > { %s629_s22 = smul.u32 72, %s791_s21  ;;  %s833_s8 = sld [smem:[#allocation2 + %s246_s7]] }
  0x15   : > { %s630_s27 = smul.u32 48, %s791_s21  ;;  %s248_s9 = sadd.s32 3, %s797_s26 }
  0x16   : > { %s224_s25 = scalar_lea.vmem %s961_s0, %s629_s22  ;;  %s843_s10 = sld [smem:[#allocation2 + %s248_s9]] }
  0x17   : > { %v610_v0 = vld [vmem:[%s224_s25 + $0x8] sm:$0xff]  ;;  %v799_v1 = vld [vmem:[%s224_s25] sm:$0xff]  ;;  %v611_v2 = vld [vmem:[%s224_s25 + $0x10] sm:$0xff]  ;;  %s825_s6 = scalar_lea.vmem %s962_s1, %s630_s27  ;;  %v333_v31 = vstv %s809_s29  ;;  %s608_s11 = sshll.u32 %s791_s21, 3 }
  0x18   : > { %v623_v3 = vmul.f32 -1.442695, %v610_v0  ;;  %v803_v4 = vld [vmem:[%s224_s25 + $0x18] sm:$0xff]  ;;  %v279_v5 = vand.u32 2147483647, %v799_v1  ;;  %v806_v6 = vld [vmem:[%s224_s25 + $0x28] sm:$0xff]  ;;  %s236_s17 = scalar_lea.vmem %s964_s3, %s608_s11 }
  0x19   : > { %v624_v7 = vmul.f32 -1.442695, %v611_v2  ;;  %v811_v8 = vld [vmem:[%s224_s25 + $0x30] sm:$0xff]  ;;  %v813_v9 = vld [vmem:[%s224_s25 + $0x38] sm:$0xff]  ;;  %v815_v10 = vld [vmem:[%s224_s25 + $0x40] sm:$0xff]  ;;  %v337_v33 = vstv %s817_s30 }
  0x1a   : > { %672 = vpow2.f32 %v623_v3  ;;  %v819_v11 = vld [vmem:[%s224_s25 + $0x20] sm:$0xff]  ;;  %v331_v12 = vmul.f32 1.442695, %v803_v4  ;;  %v280_v13 = vsub.f32 0.0, %v279_v5  ;;  %v407_v14 = vmax.f32 %v806_v6, %v811_v8  ;;  %v620_v18 = vld [vmem:[%s825_s6 + $0x18] sm:$0xff]  ;;  %v839_v22 = vld [vmem:[%s825_s6 + $0x28] sm:$0xff] }
  0x1b   : > { %674 = vpow2.f32 %v624_v7  ;;  %v408_v15 = vmax.f32 %v813_v9, %v815_v10  ;;  %v335_v17 = vmul.f32 1.442695, %v819_v11  ;;  %v621_v19 = vld [vmem:[%s825_s6 + $0x20] sm:$0xff]  ;;  %v345_v25 = vmul.f32 0.5, %v620_v18  ;;  %v846_v27 = vld [vmem:[%s825_s6 + $0x8] sm:$0xff]  ;;  %v849_v28 = vld [vmem:[%s825_s6 + $0x10] sm:$0xff] }
  0x1c   : > { %676 = vpow2.f32 %v331_v12  ;;  %v281_v21 = vmul.f32 1.442695, %v280_v13  ;;  %v347_v26 = vmul.f32 0.5, %v621_v19  ;;  %vm631_vm0 = vcmp.lt.s32.totalorder %v839_v22, 0 }
  0x1d   : > { %v841_v23 = vmax.f32 %v407_v14, %v408_v15  ;;  %v632_v35 = vceil.f32 %v839_v22  ;;  %v633_v36 = vfloor.f32 %v839_v22  ;;  %v859_v38 = vsub.f32 %v846_v27, %v345_v25 }
  0x1e   : > { %v862_v39 = vsub.f32 %v849_v28, %v347_v26  ;;  %v865_v40 = vadd.f32 %v846_v27, %v345_v25  ;;  %v868_v41 = vadd.f32 %v849_v28, %v347_v26  ;;  %v386_v44 = vstv %s833_s8 }
  0x1f   : > { %v410_v37 = vsub.f32 %v806_v6, %v841_v23  ;;  %v411_v45 = vsub.f32 %v811_v8, %v841_v23  ;;  %v387_v50 = vmul.f32 %v620_v18, %v386_v44  ;;  %v412_v51 = vsub.f32 %v813_v9, %v841_v23 }
  0x20   : > { %v673_v16 = vpop.eup %672  ;;  %v413_v52 = vsub.f32 %v815_v10, %v841_v23  ;;  %v391_v56 = vstv %s843_s10  ;;  %v634_v15 = vsel %vm631_vm0, %v632_v35, %v633_v36  ;;  %v365_v18 = vsub.f32 %v868_v41, %v862_v39 }
  0x21   : > { %v296_v20 = vadd.f32 1.0, %v673_v16  ;;  %v675_v24 = vpop.eup %674  ;;  %v414_v53 = vmul.f32 1.442695, %v410_v37  ;;  %v416_v57 = vmul.f32 1.442695, %v411_v45  ;;  %v392_v12 = vmul.f32 %v621_v19, %v391_v56 }
  0x22   : > { %v315_v30 = vadd.f32 1.0, %v675_v24  ;;  %v677_v34 = vpop.eup %676  ;;  %v418_v62 = vmul.f32 1.442695, %v412_v51  ;;  %v420_v2 = vmul.f32 1.442695, %v413_v52  ;;  %v909_v36 = vcvt.f32.s32 %v634_v15 }
  0x23   : > { %678 = vrcp.f32 %v296_v20  ;;  %v306_v29 = vand.u32 2147483647, %v296_v20  ;;  %v308_v32 = vand.u32 2147483648, %v296_v20  ;;  %vm302_vm1 = vweird.f32 %v296_v20 }
  0x24   : > { %680 = vpow2.f32 %v335_v17  ;;  %vm321_vm3 = vweird.f32 %v315_v30  ;;  %v334_v49 = vmul.f32 %v677_v34, %v333_v31  ;;  %v325_v59 = vand.u32 2147483647, %v315_v30 }
  0x25   : > { %682 = vpow2.f32 %v281_v21  ;;  %vm870_vm2 = vcmp.eq.f32.partialorder %v306_v29, 8.507059e+37  ;;  %v309_v48 = vor.u32 1.1754944e-38, %v308_v32  ;;  %v327_v60 = vand.u32 2147483648, %v315_v30 }
  0x26   : > { %684 = vrcp.f32 %v315_v30  ;;  %v339_v5 = vmul.f32 0.5, %v334_v49  ;;  %v388_v7 = vadd.f32 1e-16, %v387_v50  ;;  %v364_v17 = vsub.f32 %v865_v40, %v859_v38 }
  0x27   : > { %686 = vpow2.f32 %v414_v53  ;;  %vm898_vm7 = vcmp.eq.f32.partialorder %v325_v59, 8.507059e+37  ;;  %v328_v25 = vor.u32 1.1754944e-38, %v327_v60  ;;  %v393_v29 = vadd.f32 1e-16, %v392_v12 }
  0x28   : > { %688 = vpow2.f32 %v416_v57  ;;  %vm428_vm9 = vcmp.eq.s32.totalorder %v909_v36, 0  ;;  %vm429_vm10 = vcmp.eq.s32.totalorder %v909_v36, 1  ;;  %vm430_vm12 = vcmp.eq.s32.totalorder %v909_v36, 2 }
  0x29   : > { %v679_v42 = vpop.eup %678  ;;  %690 = vpow2.f32 %v418_v62  ;;  %v433_v15 = vsel %vm429_vm10, %v811_v8, 0.0  ;;  %v278_v24 = vmax.f32 %v799_v1, 0.0  ;;  %vm431_vm13 = vcmp.eq.s32.totalorder %v909_v36, 3 }
  0x2a   : > { %v681_v46 = vpop.eup %680  ;;  %v298_v47 = vmul.f32 %v679_v42, %v296_v20  ;;  %vm303_vm4 = vweird.f32 %v679_v42  ;;  %692 = vpow2.f32 %v420_v2 }
  0x2b   : > { %v881_v54 = vpop.eup %682  ;;  %v338_v61 = vmul.f32 %v681_v46, %v337_v33  ;;  %vm885_vm5 = vmor %vm302_vm1, %vm303_vm4  ;;  %694 = vlog2.f32 %v388_v7  ;;  %v366_v46 = vmul.f32 %v365_v18, %v364_v17  ;;  %vm486_vm4 = vcmask 1040384  }
  0x2c   : > { %v299_v55 = vsub.f32 1.0, %v298_v47  ;;  %v685_v58 = vpop.eup %684  ;;  %v283_v16 = vadd.f32 1.0, %v881_v54  ;;  %v286_v37 = vmul.f32 -0.5, %v881_v54  ;;  %v289_v56 = vand.u32 2147483647, %v881_v54 }
  0x2d   : > { %v317_v0 = vmul.f32 %v685_v58, %v315_v30  ;;  %vm322_vm6 = vweird.f32 %v685_v58  ;;  %v341_v26 = vmul.f32 0.5, %v338_v61  ;;  %v687_v31 = vpop.eup %686  ;;  %v367_v59 = vand.u32 2147483647, %v366_v46 }
  0x2e   : > { %v300_v63 = vmul.f32 %v679_v42, %v299_v55  ;;  %vm905_vm8 = vmor %vm321_vm3, %vm322_vm6  ;;  %v689_v35 = vpop.eup %688  ;;  %696 = vlog2.f32 %v283_v16  ;;  %vm926_vm11 = vcmp.lt.f32.partialorder %v289_v56, 0.0004427343  ;;  %vm490_vm6 = vcmask 1042432  }
  0x2f   : > { %v318_v14 = vsub.f32 1.0, %v317_v0  ;;  %698 = vlog2.f32 %v393_v29  ;;  %v422_v47 = vadd.f32 %v689_v35, %v687_v31  ;;  %v435_v35 = vsel %vm431_vm13, %v815_v10, 0.0 }
  0x30   : > { %v301_v13 = vadd.f32 %v679_v42, %v300_v63 }
  0x31   : > { %v319_v19 = vmul.f32 %v685_v58, %v318_v14  ;;  %v432_v14 = vsel %vm428_vm9, %v806_v6, 0.0  ;;  %v434_v6 = vsel %vm430_vm12, %v813_v9, 0.0  ;;  %vm496_vm9 = vcmask 1045504  }
  0x32   : > { %v305_v20 = vsel %vm885_vm5, %v679_v42, %v301_v13  ;;  %v691_v42 = vpop.eup %690  ;;  %v436_v21 = vadd.f32 %v433_v15, %v432_v14  ;;  %vm488_vm5 = vcmask 1041408  }
  0x33   : > { %v310_v22 = vsel %vm870_vm2, %v309_v48, %v305_v20  ;;  %v320_v32 = vadd.f32 %v685_v58, %v319_v19  ;;  %v693_v48 = vpop.eup %692  ;;  %v423_v53 = vadd.f32 %v691_v42, %v422_v47 }
  0x34   : > { %v340_v33 = vsub.f32 %v310_v22, %v339_v5  ;;  %v343_v34 = vadd.f32 %v339_v5, %v310_v22  ;;  %v695_v55 = vpop.eup %694  ;;  %v396_v5 = vsub.f32 %v310_v22, %v846_v27 }
  0x35   : > { %v324_v30 = vsel %vm905_vm8, %v685_v58, %v320_v32  ;;  %v287_v58 = vadd.f32 1.0, %v286_v37  ;;  %v424_v60 = vadd.f32 %v693_v48, %v423_v53  ;;  %v697_v61 = vpop.eup %696  ;;  %v390_v3 = vmul.f32 0.6931472, %v695_v55 }
  0x36   : > { %v351_v43 = vmin.f32 %v343_v34, %v865_v40  ;;  %v352_v44 = vmax.f32 %v340_v33, %v859_v38  ;;  %v329_v45 = vsel %vm898_vm7, %v328_v25, %v324_v30  ;;  %v360_v52 = vsub.f32 %v343_v34, %v340_v33  ;;  %v699_v2 = vpop.eup %698 }
  0x37   : > { %v342_v49 = vsub.f32 %v329_v45, %v341_v26  ;;  %v344_v50 = vadd.f32 %v341_v26, %v329_v45  ;;  %700 = vlog2.f32 %v424_v60  ;;  %v288_v12 = vmul.f32 %v881_v54, %v287_v58  ;;  %v264_v26 = vld [vmem:[%s825_s6] sm:$0xff] }
  0x38   : > { %v353_v51 = vsub.f32 %v351_v43, %v352_v44  ;;  %v285_v16 = vmul.f32 0.6931472, %v697_v61  ;;  %v395_v27 = vmul.f32 0.6931472, %v699_v2  ;;  %v401_v19 = vsub.f32 %v803_v4, %v390_v3 }
  0x39   : > { %v355_v57 = vmin.f32 %v344_v50, %v868_v41  ;;  %v356_v40 = vmax.f32 %v342_v49, %v862_v39  ;;  %v361_v38 = vsub.f32 %v344_v50, %v342_v49  ;;  %v398_v41 = vsub.f32 %v329_v45, %v849_v28 }
  0x3a   : > { %v354_v62 = vmax.f32 %v353_v51, 0.0  ;;  %v397_v28 = vmul.f32 %v396_v5, %v396_v5  ;;  %v291_v8 = vsel %vm926_vm11, %v288_v12, %v285_v16  ;;  %v402_v31 = vmul.f32 %v401_v19, %v401_v19 }
  0x3b   : > { %v357_v63 = vsub.f32 %v355_v57, %v356_v40  ;;  %v362_v0 = vmul.f32 %v361_v38, %v360_v52  ;;  %v399_v20 = vmul.f32 %v398_v41, %v398_v41  ;;  %v404_v32 = vsub.f32 %v819_v11, %v395_v27 }
  0x3c   : > { %v437_v33 = vadd.f32 %v436_v21, %v434_v6  ;;  %v292_v34 = vadd.f32 %v291_v8, %v278_v24  ;;  %vm277_vm14 = vcmp.eq.f32.partialorder %v264_v26, 0.0  ;;  %v748_v44 = vmov 0.0  }
  0x3d   : > { %v358_v39 = vmax.f32 %v357_v63, 0.0  ;;  %v363_v7 = vand.u32 2147483647, %v362_v0  ;;  %v701_v22 = vpop.eup %700  ;;  %v400_v29 = vadd.f32 %v399_v20, %v397_v28  ;;  %v405_v9 = vmul.f32 %v404_v32, %v404_v32 }
  0x3e   : > { %v426_v4 = vmul.f32 0.6931472, %v701_v22  ;;  %v438_v30 = vadd.f32 %v437_v33, %v435_v35  ;;  %v440_v43 = vsel %vm277_vm14, %v292_v34, 0.0  ;;  %v625_v36 = vsel %vm277_vm14, 1.0, %v748_v44 }
  0x3f   : > { %v359_v17 = vmul.f32 %v358_v39, %v354_v62  ;;  %v368_v18 = vadd.f32 %v367_v59, %v363_v7  ;;  %v403_v37 = vadd.f32 %v402_v31, %v400_v29  ;;  %vm276_vm15 = vcmp.eq.f32.partialorder %v264_v26, 1.0 }
  0x40   : > { %v427_v42 = vadd.f32 %v426_v4, %v841_v23  ;;  %v441_v49 = vrot.slane %v440_v43, 4  ;;  %v449_v50 = vrot.slane %v625_v36, 4  ;;  %v626_v52 = vsel %vm276_vm15, 1.0, %v748_v44 }
  0x41   : > { %v369_v54 = vsub.f32 %v368_v18, %v359_v17  ;;  %v406_v47 = vadd.f32 %v405_v9, %v403_v37  ;;  %v466_v58 = vrot.slane %v626_v52, 4  ;;  %vm492_vm7 = vcmask 1043456  }
  0x42   : > { %v439_v48 = vsub.f32 %v427_v42, %v438_v30  ;;  %v442_v56 = vadd.f32 %v441_v49, %v440_v43  ;;  %v450_v38 = vadd.f32 %v625_v36, %v449_v50  ;;  %vm494_vm8 = vcmask 1044480  }
  0x43   : > { %v370_v25 = vadd.f32 1e-06, %v369_v54  ;;  %v472_v23 = vsel %vm276_vm15, %v406_v47, 0.0  ;;  %v467_v3 = vadd.f32 %v626_v52, %v466_v58 }
  0x44   : > { %v479_v57 = vsel %vm276_vm15, %v439_v48, 0.0  ;;  %v473_v59 = vrot.slane %v472_v23, 4  ;;  %v443_v0 = vrot.slane %v442_v56, 2  ;;  %v451_v2 = vrot.slane %v450_v38, 2 }
  0x45   : > { %702 = vrcp.f32 %v370_v25  ;;  %v382_v11 = vand.u32 2147483648, %v370_v25  ;;  %vm376_vm0 = vweird.f32 %v370_v25  ;;  %v380_v10 = vand.u32 2147483647, %v370_v25 }
  0x46   : > { %v480_v61 = vrot.slane %v479_v57, 4  ;;  %v474_v5 = vadd.f32 %v473_v59, %v472_v23  ;;  %v444_v7 = vadd.f32 %v443_v0, %v442_v56  ;;  %v452_v12 = vadd.f32 %v451_v2, %v450_v38 }
  0x47   : > { %v383_v55 = vor.u32 1.1754944e-38, %v382_v11  ;;  %vm381_vm3 = vcmp.eq.f32.partialorder %v380_v10, 8.507059e+37  ;;  %v468_v14 = vrot.slane %v467_v3, 2 }
  0x48   : > { %v481_v39 = vadd.f32 %v480_v61, %v479_v57  ;;  %v475_v15 = vrot.slane %v474_v5, 2  ;;  %v445_v28 = vrot.slane %v444_v7, 1  ;;  %v453_v20 = vrot.slane %v452_v12, 1 }
  0x49   : > { %v469_v19 = vadd.f32 %v468_v14, %v467_v3 }
  0x4a   : > { %v482_v18 = vrot.slane %v481_v39, 2  ;;  %v476_v54 = vadd.f32 %v475_v15, %v474_v5  ;;  %v446_v24 = vadd.f32 %v445_v28, %v444_v7  ;;  %v454_v6 = vadd.f32 %v453_v20, %v452_v12 }
  0x4b   : > { %v703_v45 = vpop.eup %702 }
  0x4c   : > { %v372_v46 = vmul.f32 %v703_v45, %v370_v25  ;;  %vm377_vm1 = vweird.f32 %v703_v45  ;;  %v483_v21 = vadd.f32 %v482_v18, %v481_v39  ;;  %v477_v25 = vrot.slane %v476_v54, 1 }
  0x4d   : > { %vm378_vm2 = vmor %vm376_vm0, %vm377_vm1  ;;  %v487_v32 = vsel %vm486_vm4, %v446_v24, %v454_v6 }
  0x4e   : > { %v373_v51 = vsub.f32 1.0, %v372_v46  ;;  %v484_v29 = vrot.slane %v483_v21, 1  ;;  %v478_v33 = vadd.f32 %v477_v25, %v476_v54 }
  0x50   : > { %v374_v53 = vmul.f32 %v703_v45, %v373_v51 }
  0x52   : > { %v375_v40 = vadd.f32 %v703_v45, %v374_v53 }
  0x54   : > { %v379_v60 = vsel %vm378_vm2, %v703_v45, %v375_v40 }
  0x55   : > { %v384_v62 = vsel %vm381_vm3, %v383_v55, %v379_v60 }
  0x56   : > { %v385_v63 = vmul.f32 %v384_v62, %v359_v17 }
  0x58   : > { %v455_v41 = vmul.f32 %v385_v63, %v799_v1  ;;  %v470_v1 = vrot.slane %v469_v19, 1 }
  0x5a   : > { %v456_v13 = vsub.f32 %v292_v34, %v455_v41  ;;  %v471_v26 = vadd.f32 %v470_v1, %v469_v19  ;;  %v485_v34 = vadd.f32 %v484_v29, %v483_v21 }
  0x5c   : > { %v457_v16 = vsel %vm276_vm15, %v456_v13, 0.0 }
  0x5d   : > { %v458_v27 = vrot.slane %v457_v16, 4 }
  0x5f   : > { %v459_v17 = vadd.f32 %v458_v27, %v457_v16 }
  0x61   : > { %v460_v22 = vrot.slane %v459_v17, 2 }
  0x63   : > { %v461_v8 = vadd.f32 %v460_v22, %v459_v17 }
  0x65   : > { %v462_v31 = vrot.slane %v461_v8, 1 }
  0x67   : > { %v463_v4 = vadd.f32 %v462_v31, %v461_v8 }
  0x69   : > { %v489_v35 = vsel %vm488_vm5, %v487_v32, %v463_v4 }
  0x6a   : > { %v491_v37 = vsel %vm490_vm6, %v489_v35, %v471_v26 }
  0x6b   : > { %v493_v9 = vsel %vm492_vm7, %v491_v37, %v478_v33 }
  0x6c   : > { %v495_v42 = vsel %vm494_vm8, %v493_v9, %v485_v34 }
  0x6d   : > { %v497_v30 = vsel %vm496_vm9, %v495_v42, 0.0 }
  0x6e   : > { %500 = vst [vmem:[%s236_s17] sm:$0xff] %v497_v30 }
  0x6f PF: > { %s14_s14 = sadd.s32 1, %s745_s14   ;;  %s975_s12 = smov %s741_s13 }
  0x70   : > { %p11_p8 = scmp.ge.s32.totalorder %s14_s14, 5   ;;  %s976_s13 = smov %s978_s16 }
  0x72   :  { %13 = sbr.rel (!%p11_p8) target bundleno = 2 (0x2), region = 84 }
  0x77   :  { %520 = vsyncpa [#allocation3], 1 }
  0x78   :  { %522 = vsyncpa [#allocation3 + $0x1], 1 }

</bundles_post_ra>
